<compile_context>
chip_gen: v7x
topology: tpu7x:2x2x1
jax: 0.10.0
libtpu: 0.0.40
codegen_flags: <defaults>
</compile_context>

<pallas_src>
import numpy as np

import jax
import jax.numpy as jnp
from jax import lax
from jax.experimental import pallas as pl
from jax.experimental.pallas import tpu as pltpu

KS = (3, 4, 5, 7)          # conv kernel heights, matching conv1..conv4
K_MAX = max(KS)


def _cnn_kernel(x_ref, w_ref, bm_ref, wf_ref, bf_ref, o_ref):
    """One batch block: im2col matmul + bias/mask + max-pool/relu + fc + softmax."""
    # (Bb*L, K_MAX*E) bf16 @ (K_MAX*E, 4H) bf16 -> (Bb*L, 4H) f32.
    # One MXU matmul covers all 4 conv branches and all taps.
    acc = jnp.dot(x_ref[...], w_ref[...], preferred_element_type=jnp.float32)

    seq_l, h4 = bm_ref.shape
    bb = acc.shape[0] // seq_l
    # Static bias+mask table: conv bias everywhere, plus -1e30 at the <=6 tail
    # positions where a branch's window slid into the zero padding, so those
    # positions can never win the max-over-time. (Free relabel reshape when
    # L is a multiple of 8, which it is here.)
    acc = acc.reshape(bb, seq_l, h4) + bm_ref[...][None]

    # max-over-time, then ReLU on the pooled (Bb, 4H) tile only (equivalent to
    # relu-then-max: relu is monotone and every branch has >=1 valid position).
    pooled = jnp.maximum(jnp.max(acc, axis=1), 0.0)           # (Bb, 4H) f32

    logits = jnp.dot(pooled.astype(wf_ref.dtype), wf_ref[...],
                     preferred_element_type=jnp.float32) + bf_ref[...]
    m = jnp.max(logits, axis=1, keepdims=True)
    ex = jnp.exp(logits - m)                                  # padded cols -> 0
    den = jnp.sum(ex, axis=1, keepdims=True)
    o_ref[...] = ex * pl.reciprocal(den, approx=True)         # softmax(dim=1)


def _fused_weights(params):
    """Combine 4 conv weights into one (K_MAX*E, 4H) bf16 matrix + f32 bias."""
    e_size = params["emb"].shape[1]
    hidden = params["b1"].shape[-1]
    w_blocks, b_blocks = [], []
    for i, k in enumerate(KS):
        w = params[f"w{i + 1}"].reshape(k * e_size, hidden)     # (k*E, H)
        pad = jnp.zeros(((K_MAX - k) * e_size, hidden), w.dtype)
        w_blocks.append(jnp.concatenate([w, pad], axis=0))      # (K_MAX*E, H)
        b_blocks.append(params[f"b{i + 1}"])
    w_comb = jnp.concatenate(w_blocks, axis=1).astype(jnp.bfloat16)  # (K_MAX*E, 4H)
    b_comb = jnp.concatenate(b_blocks, axis=1).astype(jnp.float32)   # (1, 4H)
    return w_comb, b_comb


def _pick_b_block(batch, seq_len, target_rows=2048):
    """Largest divisor of `batch` giving ~target_rows matmul rows per step and
    >=2 grid steps when possible, restricted to sublane-friendly blocks
    (multiple of 8, or the full batch)."""
    divs = [d for d in range(1, batch + 1) if batch % d == 0]
    ok = [d for d in divs if d % 8 == 0 or d == batch]
    best = batch
    for d in sorted(ok):
        if d * seq_len <= target_rows and batch // d >= 2:
            best = d
    return best


def cnn_forward(x_ids, params, *, b_block=None):
    # Embedding gather is data-dependent; it and the im2col stacking are plain
    # JAX glue feeding the kernel (cast to bf16 as early as possible).
    embed = params["emb"][x_ids].astype(jnp.bfloat16)            # (B, L, E)
    B, L, E = embed.shape
    H = params["b1"].shape[-1]
    O = params["bf"].shape[-1]
    H4 = 4 * H
    KE = K_MAX * E
    assert L >= K_MAX, "sequence must cover the largest conv kernel"

    # Wrapper-side im2col: lane-dense (B*L, K_MAX*E) bf16 slab built from
    # K_MAX shifted slices of the zero-padded embedding.
    e_pad = jnp.pad(embed, ((0, 0), (0, K_MAX - 1), (0, 0)))
    x2d = jnp.concatenate([e_pad[:, i:i + L, :] for i in range(K_MAX)],
                          axis=-1).reshape(B * L, KE)

    w_comb, b_comb = _fused_weights(params)

    # Static bias + (-1e30) mask: position l is invalid for a branch with
    # kernel k iff l >= L - k + 1 (window slid into the zero padding).
    vlen = np.concatenate([np.full((H,), L - k + 1, np.int64) for k in KS])
    mask = np.where(np.arange(L)[:, None] < vlen[None, :], 0.0, -1e30)
    bm = jnp.asarray(mask, jnp.float32) + b_comb                 # (L, 4H)

    # Lane-dense classifier: pad O up to a multiple of 128 with zero weight
    # columns and -1e30 bias so padded columns vanish in the softmax.
    O_pad = max(128, -(-O // 128) * 128)
    wf_pad = jnp.zeros((H4, O_pad), jnp.bfloat16).at[:, :O].set(
        params["wf"].astype(jnp.bfloat16))
    bf_pad = jnp.full((1, O_pad), -1e30, jnp.float32).at[:, :O].set(
        params["bf"].astype(jnp.float32))

    if b_block is None:
        b_block = _pick_b_block(B, L)
    assert B % b_block == 0
    assert (b_block % 8 == 0) or (b_block == B)

    const = lambda b: (0, 0)   # weights/bias/mask: same block every grid step
    cost = pl.CostEstimate(
        flops=2 * B * L * KE * H4 + 2 * B * H4 * O_pad,
        transcendentals=B * O_pad,
        bytes_accessed=int(x2d.size * 2 + w_comb.size * 2 + bm.size * 4
                           + wf_pad.size * 2 + bf_pad.size * 4 + B * O_pad * 4),
    )

    out = pl.pallas_call(
        _cnn_kernel,
        out_shape=jax.ShapeDtypeStruct((B, O_pad), jnp.float32),
        grid=(B // b_block,),
        in_specs=[
            pl.BlockSpec((b_block * L, KE), lambda b: (b, 0)),   # im2col slab
            pl.BlockSpec((KE, H4), const),                       # fused conv weight
            pl.BlockSpec((L, H4), const),                        # bias + static mask
            pl.BlockSpec((H4, O_pad), const),                    # fc weight (padded)
            pl.BlockSpec((1, O_pad), const),                     # fc bias (padded)
        ],
        out_specs=pl.BlockSpec((b_block, O_pad), lambda b: (b, 0)),
        compiler_params=pltpu.CompilerParams(
            dimension_semantics=("parallel",)),
        cost_estimate=cost,
    )(x2d, w_comb, bm, wf_pad, bf_pad)
    return out[:, :O]


def init_params(key, v_size, e_size, hidden, output):
    keys = jax.random.split(key, 11)
    emb = 0.1 * jax.random.normal(keys[0], (v_size, e_size), jnp.float32)
    emb = emb.at[0].set(0.0)   # padding_idx=0
    params = {"emb": emb}
    for i, k in enumerate(KS):
        # torch shape (hidden, 1, k, e_size) -> kernel layout (k, e_size, hidden)
        w_t = 0.1 * jax.random.normal(keys[1 + 2 * i],
                                      (hidden, 1, k, e_size), jnp.float32)
        params[f"w{i + 1}"] = jnp.transpose(w_t[:, 0], (1, 2, 0))
        params[f"b{i + 1}"] = 0.1 * jax.random.normal(
            keys[2 + 2 * i], (1, hidden), jnp.float32)
    # torch fc weight (output, 4*hidden) -> (4*hidden, output)
    wf_t = 0.1 * jax.random.normal(keys[9], (output, 4 * hidden), jnp.float32)
    params["wf"] = wf_t.T
    params["bf"] = 0.1 * jax.random.normal(keys[10], (1, output), jnp.float32)
    return params


def reference(x_ids, params):
    """Plain-JAX (f32) reproduction of the PyTorch forward (eval mode)."""
    embed = params["emb"][x_ids]                              # (B, L, E)
    L = embed.shape[1]
    pooled = []
    for i, k in enumerate(KS):
        w = params[f"w{i + 1}"]                               # (k, E, H)
        b = params[f"b{i + 1}"]                               # (1, H)
        L_out = L - k + 1
        c = sum(jnp.einsum("ble,eh->blh", embed[:, j:j + L_out], w[j])
                for j in range(k)) + b[None]
        c = jnp.maximum(c, 0.0)
        pooled.append(jnp.max(c, axis=1))                     # (B, H)
    pool = jnp.concatenate(pooled, axis=1)                    # (B, 4H)
    logits = pool @ params["wf"] + params["bf"]
    return jax.nn.softmax(logits, axis=1)


if __name__ == "__main__":
    V, E, H, O = 100, 32, 32, 8       # v_size, e_size, hidden, output
    B, L = 2, 16                      # batch, sequence length

    key = jax.random.PRNGKey(0)
    k_par, k_x = jax.random.split(key)
    params = init_params(k_par, V, E, H, O)
    x_ids = jax.random.randint(k_x, (B, L), 0, V, dtype=jnp.int32)

    out = jax.block_until_ready(cnn_forward(x_ids, params))
    ref = jax.block_until_ready(reference(x_ids, params))

    assert out.shape == (B, O)
    # bf16 matmul inputs + approx softmax reciprocal vs. f32 reference.
    assert jnp.allclose(out, ref, atol=1e-2), (out, ref)
    assert jnp.allclose(jnp.sum(out, axis=1), 1.0, atol=1e-2)

    print("KERNEL_OK")
</pallas_src>

<mosaic_0001>
module attributes {stable_mosaic.version = 11 : i64} {
  func.func @_cnn_kernel(%arg0: i32, %arg1: memref<32x224xbf16, #tpu.memory_space<vmem>>, %arg2: memref<224x128xbf16, #tpu.memory_space<vmem>>, %arg3: memref<16x128xf32, #tpu.memory_space<vmem>>, %arg4: memref<128x128xbf16, #tpu.memory_space<vmem>>, %arg5: memref<1x128xf32, #tpu.memory_space<vmem>>, %arg6: memref<2x128xf32, #tpu.memory_space<vmem>>) attributes {dimension_semantics = [#tpu.dimension_semantics<parallel>], iteration_bounds = array<i64: 1>, scalar_prefetch = 0 : i64, scratch_operands = 0 : i64, tpu.core_type = #tpu.core_type<tc>, window_params = [{transform_indices = @transform_0, window_bounds = array<i64: 32, 224>}, {pipeline_mode = #tpu.pipeline_mode<synchronous>, transform_indices = @transform_1, window_bounds = array<i64: 224, 128>}, {pipeline_mode = #tpu.pipeline_mode<synchronous>, transform_indices = @transform_2, window_bounds = array<i64: 16, 128>}, {pipeline_mode = #tpu.pipeline_mode<synchronous>, transform_indices = @transform_3, window_bounds = array<i64: 128, 128>}, {pipeline_mode = #tpu.pipeline_mode<synchronous>, transform_indices = @transform_4, window_bounds = array<i64: 1, 128>}, {transform_indices = @transform_5, window_bounds = array<i64: 2, 128>}]} {
    %c0 = arith.constant 0 : index
    %c0_0 = arith.constant 0 : index
    %0 = vector.load %arg1[%c0, %c0_0] : memref<32x224xbf16, #tpu.memory_space<vmem>>, vector<32x224xbf16>
    %c0_1 = arith.constant 0 : index
    %c0_2 = arith.constant 0 : index
    %1 = vector.load %arg2[%c0_1, %c0_2] : memref<224x128xbf16, #tpu.memory_space<vmem>>, vector<224x128xbf16>
    %cst = arith.constant dense<0.000000e+00> : vector<32x128xf32>
    %2 = tpu.matmul %0, %1, %cst {dimension_numbers = #tpu.dot_dimension_numbers<[1], [0], [0], [1], [0, 0, 1, 1], [], []>} : vector<32x224xbf16>, vector<224x128xbf16>, vector<32x128xf32> -> vector<32x128xf32>
    %3 = vector.shape_cast %2 : vector<32x128xf32> to vector<2x16x128xf32>
    %c0_3 = arith.constant 0 : index
    %c0_4 = arith.constant 0 : index
    %4 = vector.load %arg3[%c0_3, %c0_4] : memref<16x128xf32, #tpu.memory_space<vmem>>, vector<16x128xf32>
    %5 = vector.shape_cast %4 : vector<16x128xf32> to vector<1x16x128xf32>
    %6 = vector.broadcast %5 : vector<1x16x128xf32> to vector<2x16x128xf32>
    %7 = arith.addf %3, %6 : vector<2x16x128xf32>
    %cst_5 = arith.constant dense<0xFF800000> : vector<2x128xf32>
    %8 = vector.multi_reduction <maximumf>, %7, %cst_5 [1] : vector<2x16x128xf32> to vector<2x128xf32>
    %cst_6 = arith.constant 0.000000e+00 : f32
    %9 = vector.broadcast %cst_6 : f32 to vector<2x128xf32>
    %10 = arith.maximumf %8, %9 : vector<2x128xf32>
    %11 = arith.truncf %10 : vector<2x128xf32> to vector<2x128xbf16>
    %c0_7 = arith.constant 0 : index
    %c0_8 = arith.constant 0 : index
    %12 = vector.load %arg4[%c0_7, %c0_8] : memref<128x128xbf16, #tpu.memory_space<vmem>>, vector<128x128xbf16>
    %cst_9 = arith.constant dense<0.000000e+00> : vector<2x128xf32>
    %13 = tpu.matmul %11, %12, %cst_9 {dimension_numbers = #tpu.dot_dimension_numbers<[1], [0], [0], [1], [0, 0, 1, 1], [], []>} : vector<2x128xbf16>, vector<128x128xbf16>, vector<2x128xf32> -> vector<2x128xf32>
    %c0_10 = arith.constant 0 : index
    %c0_11 = arith.constant 0 : index
    %14 = vector.load %arg5[%c0_10, %c0_11] : memref<1x128xf32, #tpu.memory_space<vmem>>, vector<1x128xf32>
    %15 = vector.broadcast %14 : vector<1x128xf32> to vector<2x128xf32>
    %16 = arith.addf %13, %15 : vector<2x128xf32>
    %cst_12 = arith.constant dense<0xFF800000> : vector<2xf32>
    %17 = vector.multi_reduction <maximumf>, %16, %cst_12 [1] : vector<2x128xf32> to vector<2xf32>
    %18 = vector.shape_cast %17 : vector<2xf32> to vector<2x1xf32>
    %19 = vector.broadcast %18 : vector<2x1xf32> to vector<2x128xf32>
    %20 = arith.subf %16, %19 : vector<2x128xf32>
    %21 = math.exp %20 : vector<2x128xf32>
    %cst_13 = arith.constant dense<0.000000e+00> : vector<2xf32>
    %22 = vector.multi_reduction <add>, %21, %cst_13 [1] : vector<2x128xf32> to vector<2xf32>
    %23 = vector.shape_cast %22 : vector<2xf32> to vector<2x1xf32>
    %24 = tpu.reciprocal %23 {approx = true} : vector<2x1xf32> -> vector<2x1xf32>
    %25 = vector.broadcast %24 : vector<2x1xf32> to vector<2x128xf32>
    %26 = arith.mulf %21, %25 : vector<2x128xf32>
    %c0_14 = arith.constant 0 : index
    %c0_15 = arith.constant 0 : index
    %27 = vector.load %arg6[%c0_14, %c0_15] : memref<2x128xf32, #tpu.memory_space<vmem>>, vector<2x128xf32>
    tpu.vector_store %arg6[%c0_14, %c0_15], %26 {strides = array<i32>} : memref<2x128xf32, #tpu.memory_space<vmem>>, vector<2x128xf32>,
    return
  }
  func.func @transform_0(%arg0: i32) -> (i32, i32) {
    %c0_i32 = arith.constant 0 : i32
    %c0_i32_0 = arith.constant 0 : i32
    return %arg0, %c0_i32 : i32, i32
  }
  func.func @transform_1(%arg0: i32) -> (i32, i32) {
    %c0_i32 = arith.constant 0 : i32
    %c0_i32_0 = arith.constant 0 : i32
    %c0_i32_1 = arith.constant 0 : i32
    return %c0_i32, %c0_i32_0 : i32, i32
  }
  func.func @transform_2(%arg0: i32) -> (i32, i32) {
    %c0_i32 = arith.constant 0 : i32
    %c0_i32_0 = arith.constant 0 : i32
    %c0_i32_1 = arith.constant 0 : i32
    return %c0_i32, %c0_i32_0 : i32, i32
  }
  func.func @transform_3(%arg0: i32) -> (i32, i32) {
    %c0_i32 = arith.constant 0 : i32
    %c0_i32_0 = arith.constant 0 : i32
    %c0_i32_1 = arith.constant 0 : i32
    return %c0_i32, %c0_i32_0 : i32, i32
  }
  func.func @transform_4(%arg0: i32) -> (i32, i32) {
    %c0_i32 = arith.constant 0 : i32
    %c0_i32_0 = arith.constant 0 : i32
    %c0_i32_1 = arith.constant 0 : i32
    return %c0_i32, %c0_i32_0 : i32, i32
  }
  func.func @transform_5(%arg0: i32) -> (i32, i32) {
    %c0_i32 = arith.constant 0 : i32
    %c0_i32_0 = arith.constant 0 : i32
    return %arg0, %c0_i32 : i32, i32
  }
}

</mosaic_0001>

<bundles_post_ra>
// kernel: tpu_custom_call.1
= control target key start
LH: loop header
LB: loop body
LE: loop exit
PB: predicated region body
PF: predicated region fallthrough
CT: control target
= control target key end

     0   :  { %10 = vsyncpa [#allocation3], 0  ;;  %s780_s0 = inlined_call_operand.hbm [shape: bf16[32,224], index: 0, kind: input, shape index: {}]   ;;  %s781_s1 = inlined_call_operand.hbm [shape: bf16[224,128], index: 1, kind: input, shape index: {}]   ;;  %s782_s2 = inlined_call_operand.hbm [shape: f32[16,128], index: 2, kind: input, shape index: {}]   ;;  %s783_s3 = inlined_call_operand.hbm [shape: bf16[128,128], index: 3, kind: input, shape index: {}]   ;;  %s784_s4 = inlined_call_operand.vmem [shape: f32[1,128], index: 4, kind: input, shape index: {}]   ;;  %s785_s5 = inlined_call_operand.hbm [shape: f32[2,128], index: 5, kind: output, shape index: {}]  }
   0x1   :  { %11 = vsyncpa [#allocation6], 0 }
   0x2   :  { %12 = vsyncpa [#allocation9], 0 }
   0x3   :  { %13 = vsyncpa [#allocation4], 0  ;;  %s660_s18 = smov [#allocation5]   ;;  %s542_s22 = scalar_lea.hbm %s781_s1, 1792 }
   0x4   :  { %s31_s19 = sshll.u32 %s660_s18, 4  ;;  %p543_p0 = scmp.ne.s32.totalorder %s781_s1, %s542_s22  ;;  %s32_s19 = int_to_ptr.vmem [resolvable:$true] %s31_s19 }
   0x5   :  { %p546_p1 = scmp.lt.u32.totalorder %s542_s22, %s781_s1 }
   0x7   :  { %p548_p2 = pnand %p546_p1, %p543_p0 }
   0x9   :  { %551 = shalt.err (!%p548_p2)
}
   0xa   :  { %s552_s27 = scalar_lea.vmem %s32_s19, 1792  ;;  %p557_p4 = scmp.lt.s32.totalorder %s32_s19, %s32_s19 }
   0xb   :  { %p553_p3 = scmp.ne.s32.totalorder %s32_s19, %s552_s27  ;;  %p558_p5 = scmp.lt.s32.totalorder %s552_s27, %s552_s27 }
   0xd   :  { %p559_p6 = por %p558_p5, %p557_p4 }
   0xf   :  { %p560_p7 = pnand %p559_p6, %p553_p3 }
  0x11   :  { %563 = shalt.err (!%p560_p7)
}
  0x12   :  { %s661_s28 = smov 64   ;;  %s662_s29 = smov 4  }
  0x13   :  { %37 = dma.hbm_to_vmem [thread:$0]  %s781_s1, 1792, %s32_s19, [#allocation6], %s661_s28, %s661_s28, %s662_s29  }
  0x14   :  { %s663_s7 = smov [#allocation2]   ;;  %s564_s11 = scalar_lea.hbm %s780_s0, 512 }
  0x15   :  { %s19_s8 = sshll.u32 %s663_s7, 4  ;;  %p565_p8 = scmp.ne.s32.totalorder %s780_s0, %s564_s11  ;;  %s20_s8 = int_to_ptr.vmem [resolvable:$true] %s19_s8 }
  0x16   :  { %p568_p9 = scmp.lt.u32.totalorder %s564_s11, %s780_s0 }
  0x18   :  { %p570_p10 = pnand %p568_p9, %p565_p8 }
  0x1a   :  { %573 = shalt.err (!%p570_p10)
}
  0x1b   :  { %s574_s16 = scalar_lea.vmem %s20_s8, 512  ;;  %p579_p12 = scmp.lt.s32.totalorder %s20_s8, %s20_s8 }
  0x1c   :  { %p575_p11 = scmp.ne.s32.totalorder %s20_s8, %s574_s16  ;;  %p580_p13 = scmp.lt.s32.totalorder %s574_s16, %s574_s16 }
  0x1e   :  { %p581_p0 = por %p580_p13, %p579_p12 }
  0x20   :  { %p582_p1 = pnand %p581_p0, %p575_p11 }
  0x22   :  { %585 = shalt.err (!%p582_p1)
}
  0x23   :  { %s664_s1 = smov 128   ;;  %s665_s17 = smov 8  }
  0x24   :  { %25 = dma.hbm_to_vmem [thread:$0]  %s780_s0, 512, %s20_s8, [#allocation3], %s664_s1, %s664_s1, %s665_s17  }
  0x25   :  { %s666_s20 = smov [#allocation7]   ;;  %s667_s22 = smov [#allocation8]  }
  0x26   :  { %s43_s21 = sshll.u32 %s666_s20, 4  ;;  %s55_s23 = sshll.u32 %s667_s22, 4  ;;  %s44_s21 = int_to_ptr.vmem [resolvable:$true] %s43_s21  ;;  %s729_s23 = int_to_ptr.vmem [resolvable:$true] %s55_s23 }
  0x27   :  { %s586_s26 = scalar_lea.hbm %s782_s2, 256 }
  0x28   :  { %p587_p2 = scmp.ne.s32.totalorder %s782_s2, %s586_s26  ;;  %p590_p3 = scmp.lt.u32.totalorder %s586_s26, %s782_s2 }
  0x2a   :  { %p592_p4 = pnand %p590_p3, %p587_p2 }
  0x2c   :  { %595 = shalt.err (!%p592_p4)
}
  0x2d   :  { %s596_s0 = scalar_lea.vmem %s44_s21, 256  ;;  %p601_p6 = scmp.lt.s32.totalorder %s44_s21, %s44_s21 }
  0x2e   :  { %p597_p5 = scmp.ne.s32.totalorder %s44_s21, %s596_s0  ;;  %p602_p7 = scmp.lt.s32.totalorder %s596_s0, %s596_s0 }
  0x30   :  { %p603_p8 = por %p602_p7, %p601_p6 }
  0x32   :  { %p604_p9 = pnand %p603_p8, %p597_p5 }
  0x34   :  { %607 = shalt.err (!%p604_p9)
}
  0x35   :  { %49 = dma.hbm_to_vmem [thread:$0]  %s782_s2, 256, %s44_s21, [#allocation6], %s664_s1, %s664_s1, %s665_s17  }
  0x36   :  { %s608_s12 = scalar_lea.hbm %s783_s3, 1024 }
  0x37   :  { %p609_p10 = scmp.ne.s32.totalorder %s783_s3, %s608_s12  ;;  %p612_p11 = scmp.lt.u32.totalorder %s608_s12, %s783_s3 }
  0x39   :  { %p614_p12 = pnand %p612_p11, %p609_p10 }
  0x3b   :  { %617 = shalt.err (!%p614_p12)
}
  0x3c   :  { %s618_s18 = scalar_lea.vmem %s729_s23, 1024  ;;  %p623_p0 = scmp.lt.s32.totalorder %s729_s23, %s729_s23 }
  0x3d   :  { %p619_p13 = scmp.ne.s32.totalorder %s729_s23, %s618_s18  ;;  %p624_p1 = scmp.lt.s32.totalorder %s618_s18, %s618_s18 }
  0x3f   :  { %p625_p2 = por %p624_p1, %p623_p0 }
  0x41   :  { %p626_p3 = pnand %p625_p2, %p619_p13 }
  0x43   :  { %629 = shalt.err (!%p626_p3)
}
  0x44   :  { %61 = dma.hbm_to_vmem [thread:$0]  %s783_s3, 1024, %s729_s23, [#allocation9], %s661_s28, %s661_s28, %s662_s29  }
  0x45   :  { %652 = dma.done.wait [#allocation3], 512  }
  0x46   :  { %653 = vsyncadd [#allocation3], 4294966784 }
  0x47   :  { %654 = dma.done.wait [#allocation6], 2048  }
  0x48   :  { %655 = vsyncadd [#allocation6], 4294965248 }
  0x49   :  { %656 = dma.done.wait [#allocation9], 1024  }
  0x4a   :  { %657 = vsyncadd [#allocation9], 4294966272  ;;  %v668_v0 = vmov 0   ;;  %v510_v1 = vld [vmem:[#allocation5] sm:$0xff]   ;;  %v511_v2 = vld [vmem:[#allocation5 + $0x8] sm:$0xff]   ;;  %vm211_vm0 = vcmask 785408  }
  0x4b   :  { %218 = vmatprep.subr.bf16.mxu0 %v668_v0  ;;  %v512_v3 = vld [vmem:[#allocation5 + $0x10] sm:$0xff]   ;;  %v513_v4 = vld [vmem:[#allocation5 + $0x18] sm:$0xff]   ;;  %v514_v5 = vld [vmem:[#allocation5 + $0x20] sm:$0xff]   ;;  %v669_v20 = vmov 0.0   ;;  %vm670_vm1 = vmmov 0   ;;  %vm318_vm2 = vcmask 1041409  }
  0x4c   :  { %219 = vmatpush1.bf16.msra.mxu0 %v510_v1  ;;  %v526_v6 = vld [vmem:[#allocation2 + $0x4] ss:$8 sps:$4 sm:$0xff]   ;;  %v516_v8 = vld [vmem:[#allocation5 + $0x30] sm:$0xff]   ;;  %v517_v9 = vld [vmem:[#allocation5 + $0x38] sm:$0xff]   ;;  %478 = vmatprep.subr.bf16.mxu1 %v669_v20  ;;  %vm410_vm3 = vcmask 1041408   ;;  %s671_s29 = smov [#allocation10]  }
  0x4d   :  { %220 = vmatprep.subr.bf16.mxu0 %v668_v0  ;;  %v515_v7 = vld [vmem:[#allocation5 + $0x28] sm:$0xff]   ;;  %458 = vmatprep.mubr.msk.bf16.mxu0 %vm211_vm0, %v526_v6  ;;  %v518_v10 = vld [vmem:[#allocation5 + $0x40] sm:$0xff]   ;;  %v520_v12 = vld [vmem:[#allocation5 + $0x50] sm:$0xff]   ;;  %s429_s17 = sshll.u32 %s671_s29, 4  ;;  %s430_s17 = int_to_ptr.vmem [resolvable:$true] %s429_s17 }
  0x4e   :  { %v519_v11 = vld [vmem:[#allocation5 + $0x48] sm:$0xff]   ;;  %v521_v13 = vld [vmem:[#allocation5 + $0x58] sm:$0xff]   ;;  %v522_v14 = vld [vmem:[#allocation5 + $0x60] sm:$0xff]   ;;  %494 = vmatprep.mubr.msk.bf16.mxu1 %vm670_vm1, %v669_v20  ;;  %p635_p5 = scmp.lt.s32.totalorder %s430_s17, %s430_s17 }
  0x4f   :  { %v523_v15 = vld [vmem:[#allocation5 + $0x68] sm:$0xff]   ;;  %v527_v17 = vld [vmem:[#allocation2 + $0x14] ss:$8 sps:$4 sm:$0xff]   ;;  %v529_v18 = vld [vmem:[#allocation2 + $0x10] ss:$8 sps:$4 sm:$0xff]  }
  0x50   :  { %221 = vmatpush1.bf16.msra.mxu0 %v511_v2  ;;  %v524_v16 = vld [vmem:[#allocation2] ss:$8 sps:$4 sm:$0xff]   ;;  %v532_v22 = vld [vmem:[#allocation8 + $0x10] sm:$0xff]   ;;  %v533_v23 = vld [vmem:[#allocation8 + $0x18] sm:$0xff]  }
  0x51   :  { %222 = vmatprep.subr.bf16.mxu0 %v668_v0  ;;  %v530_v19 = vld [vmem:[#allocation8] sm:$0xff]   ;;  %v531_v21 = vld [vmem:[#allocation8 + $0x8] sm:$0xff]   ;;  %v536_v26 = vld [vmem:[#allocation8 + $0x30] sm:$0xff]  }
  0x52   :  { %479 = vmatpush3.bf16.msra.mxu1 %v530_v19  ;;  %v534_v24 = vld [vmem:[#allocation8 + $0x20] sm:$0xff]   ;;  %v535_v25 = vld [vmem:[#allocation8 + $0x28] sm:$0xff]   ;;  %v537_v27 = vld [vmem:[#allocation8 + $0x38] sm:$0xff]  }
  0x53   :  { %480 = vmatprep.subr.bf16.mxu1 %v669_v20  ;;  %v267_v29 = vld [vmem:[#allocation7] sm:$0xff]  ;;  %v268_v30 = vld [vmem:[#allocation7 + $0x8] sm:$0xff] }
  0x54   :  { %223 = vmatpush1.bf16.msra.mxu0 %v512_v3 }
  0x55   :  { %224 = vmatprep.subr.bf16.mxu0 %v668_v0 }
  0x56   :  { %481 = vmatpush3.bf16.msra.mxu1 %v531_v21 }
  0x57   :  { %482 = vmatprep.subr.bf16.mxu1 %v669_v20 }
  0x58   :  { %225 = vmatpush1.bf16.msra.mxu0 %v513_v4 }
  0x59   :  { %226 = vmatprep.subr.bf16.mxu0 %v668_v0 }
  0x5a   :  { %483 = vmatpush3.bf16.msra.mxu1 %v532_v22 }
  0x5b   :  { %484 = vmatprep.subr.bf16.mxu1 %v669_v20 }
  0x5c   :  { %227 = vmatpush1.bf16.msra.mxu0 %v514_v5 }
  0x5d   :  { %228 = vmatprep.subr.bf16.mxu0 %v668_v0 }
  0x5e   :  { %485 = vmatpush3.bf16.msra.mxu1 %v533_v23 }
  0x5f   :  { %486 = vmatprep.subr.bf16.mxu1 %v669_v20 }
  0x60   :  { %229 = vmatpush1.bf16.msra.mxu0 %v515_v7 }
  0x61   :  { %230 = vmatprep.subr.bf16.mxu0 %v668_v0 }
  0x62   :  { %487 = vmatpush3.bf16.msra.mxu1 %v534_v24 }
  0x63   :  { %488 = vmatprep.subr.bf16.mxu1 %v669_v20 }
  0x64   :  { %231 = vmatpush1.bf16.msra.mxu0 %v516_v8 }
  0x65   :  { %232 = vmatprep.subr.bf16.mxu0 %v668_v0 }
  0x66   :  { %489 = vmatpush3.bf16.msra.mxu1 %v535_v25 }
  0x67   :  { %490 = vmatprep.subr.bf16.mxu1 %v669_v20 }
  0x68   :  { %233 = vmatpush1.bf16.msra.mxu0 %v517_v9 }
  0x69   :  { %234 = vmatprep.subr.bf16.mxu0 %v668_v0 }
  0x6a   :  { %491 = vmatpush3.bf16.msra.mxu1 %v536_v26 }
  0x6b   :  { %492 = vmatprep.subr.bf16.mxu1 %v669_v20 }
  0x6c   :  { %235 = vmatpush1.bf16.msra.mxu0 %v518_v10 }
  0x6d   :  { %236 = vmatprep.subr.bf16.mxu0 %v668_v0 }
  0x6e   :  { %493 = vmatpush3.bf16.msra.mxu1 %v537_v27 }
  0x70   :  { %237 = vmatpush1.bf16.msra.mxu0 %v519_v11 }
  0x71   :  { %238 = vmatprep.subr.bf16.mxu0 %v668_v0 }
  0x74   :  { %239 = vmatpush1.bf16.msra.mxu0 %v520_v12 }
  0x75   :  { %240 = vmatprep.subr.bf16.mxu0 %v668_v0 }
  0x78   :  { %241 = vmatpush1.bf16.msra.mxu0 %v521_v13 }
  0x79   :  { %242 = vmatprep.subr.bf16.mxu0 %v668_v0 }
  0x7c   :  { %243 = vmatpush1.bf16.msra.mxu0 %v522_v14 }
  0x7d   :  { %244 = vmatprep.subr.bf16.mxu0 %v668_v0  ;;  %v460_v0 = vld [vmem:[%s784_s4] ss:$0 sm:$0xff]  ;;  %s630_s4 = scalar_lea.vmem %s430_s17, 32 }
  0x7e   :  { %p631_p4 = scmp.ne.s32.totalorder %s430_s17, %s630_s4  ;;  %p636_p6 = scmp.lt.s32.totalorder %s630_s4, %s630_s4 }
  0x80   :  { %245 = vmatpush1.bf16.msra.mxu0 %v523_v15  ;;  %p637_p7 = por %p636_p6, %p635_p5 }
  0x82   :  { %p638_p8 = pnand %p637_p7, %p631_p4 }
  0x83   :  { %251 = vmatmul.mubr.bf16.vlgmr.msra.gmra.mrb[0].mxu0 %v524_v16 }
  0x84   :  { %459 = vmatprep.mubr.msk.bf16.mxu0 %vm211_vm0, %v527_v17 }
  0x8b   :  { %259 = vmatmul.mubr.bf16.gmra.mrb[4].mxu0 %v529_v18 }
 0x156   :  { %v252_v28 = vpop.f32.mrb[0].mxu0 }
 0x157   :  { %v254_v31 = vpop.f32.mrb[1].mxu0  ;;  %v269_v33 = vadd.f32 %v267_v29, %v252_v28 }
 0x158   :  { %v255_v32 = vpop.f32.mrb[2].mxu0 }
 0x159   :  { %v270_v34 = vadd.f32 %v268_v30, %v255_v32  ;;  %v257_v35 = vpop.f32.mrb[3].mxu0 }
 0x15b   :  { %v273_v36 = vmax.f32 %v269_v33, %v270_v34 }
 0x15d   :  { %v274_v37 = vrot.slane %v273_v36, 4 }
 0x15e   :  { %v260_v38 = vpop.f32.mrb[4].mxu0 }
 0x15f   :  { %v275_v39 = vmax.f32 %v273_v36, %v274_v37  ;;  %v262_v40 = vpop.f32.mrb[5].mxu0  ;;  %v271_v43 = vadd.f32 %v267_v29, %v260_v38 }
 0x160   :  { %v263_v41 = vpop.f32.mrb[6].mxu0 }
 0x161   :  { %v276_v42 = vrot.slane %v275_v39, 2  ;;  %v272_v44 = vadd.f32 %v268_v30, %v263_v41  ;;  %v265_v45 = vpop.f32.mrb[7].mxu0 }
 0x163   :  { %v277_v46 = vmax.f32 %v275_v39, %v276_v42  ;;  %v280_v47 = vmax.f32 %v271_v43, %v272_v44 }
 0x165   :  { %v278_v48 = vrot.slane %v277_v46, 1  ;;  %v281_v49 = vrot.slane %v280_v47, 4 }
 0x167   :  { %v282_v50 = vmax.f32 %v280_v47, %v281_v49  ;;  %v279_v51 = vmax.f32 %v277_v46, %v278_v48 }
 0x169   :  { %v283_v52 = vrot.slane %v282_v50, 2  ;;  %v287_v54 = vmax.f32 %v279_v51, 0.0 }
 0x16b   :  { %v284_v53 = vmax.f32 %v282_v50, %v283_v52  ;;  %v289_v58 = vpack.c.bf16 %v287_v54, %v287_v54 }
 0x16d   :  { %v285_v55 = vrot.slane %v284_v53, 1  ;;  %v316_v60 = vunpack.c.l.b16 %v289_v58 }
 0x16f   :  { %v286_v56 = vmax.f32 %v284_v53, %v285_v55 }
 0x171   :  { %v288_v57 = vmax.f32 %v286_v56, 0.0 }
 0x173   :  { %v290_v59 = vpack.c.bf16 %v288_v57, %v288_v57 }
 0x175   :  { %v317_v61 = vunpack.c.l.b16 %v290_v59 }
 0x177   :  { %v319_v62 = vsel %vm318_vm2, %v317_v61, %v316_v60 }
 0x178   :  { %v320_v63 = vpack.c.b16 %v319_v62, %v319_v62 }
 0x17a   :  { %495 = vmatmul.mubr.bf16.vlgmr.msra.gmra.mrb[0].mxu1 %v320_v63 }
 0x24d   :  { %v404_v1 = vpop.f32.mrb[0].mxu1 }
 0x24e   :  { %v405_v2 = vadd.f32 %v460_v0, %v404_v1  ;;  %v496_v3 = vpop.f32.mrb[1].mxu1 }
 0x24f   :  { %v407_v4 = vpop.f32.mrb[2].mxu1 }
 0x250   :  { %v497_v5 = vpop.f32.mrb[3].mxu1  ;;  %v411_v6 = vsel %vm410_vm3, %v405_v2, -inf }
 0x251   :  { %412 = vmax.xlane.f32.xlu0 %v411_v6 }
 0x2de   :  { %v413_v7 = vpop.xlane.xlu0 %412 }
 0x2df   :  { %v414_v8 = vsub.f32 %v405_v2, %v413_v7 }
 0x2e1   :  { %v415_v9 = vmul.f32 1.442695, %v414_v8 }
 0x2e3   :  { %538 = vpow2.f32 %v415_v9 }
 0x2ed   :  { %v539_v10 = vpop.eup %538 }
 0x2ee   :  { %v417_v11 = vsel %vm410_vm3, %v539_v10, 0.0 }
 0x2ef   :  { %418 = vadd.xlane.f32.xlu0 %v417_v11 }
 0x37c   :  { %v419_v12 = vpop.xlane.xlu0 %418 }
 0x37d   :  { %540 = vrcp.f32 %v419_v12 }
 0x387   :  { %v541_v13 = vpop.eup %540 }
 0x388   :  { %v421_v14 = vmul.f32 %v541_v13, %v539_v10 }
 0x38a   :  { %422 = vst [vmem:[#allocation10] sm:$0x3] %v421_v14 }
 0x38b   :  { %641 = shalt.err (!%p638_p8)
}
 0x38c   :  { %s642_s21 = scalar_lea.hbm %s785_s5, 32 }
 0x38d   :  { %p643_p9 = scmp.ne.s32.totalorder %s785_s5, %s642_s21  ;;  %p646_p10 = scmp.lt.u32.totalorder %s642_s21, %s785_s5 }
 0x38f   :  { %p648_p11 = pnand %p646_p10, %p643_p9 }
 0x391   :  { %651 = shalt.err (!%p648_p11)
}
 0x392   :  { %432 = dma.vmem_to_hbm [thread:$0]  %s430_s17, 32, %s785_s5, [#allocation4]  }
 0x393   :  { %658 = dma.done.wait [#allocation4], 32  }
 0x394   :  { %659 = vsyncadd [#allocation4], 4294967264 }
 0x395   :  { %436 = vsyncpa [#allocation3], 1 }
 0x396   :  { %437 = vsyncpa [#allocation6], 1 }
 0x397   :  { %438 = vsyncpa [#allocation9], 1 }
 0x398   :  { %439 = vsyncpa [#allocation4], 1 }

</bundles_post_ra>
